<compile_context>
chip_gen: v6e
topology: v6e:2x2x1
jax: 0.10.0
libtpu: 0.0.40
codegen_flags: <defaults>
</compile_context>

<pallas_src>
import jax
import jax.numpy as jnp
from jax.experimental import pallas as pl
from jax.experimental.pallas import tpu as pltpu  # noqa: F401  (TPU backend assumed)

# ----------------------------- configuration ------------------------------
B = 2            # batch
LATENT = 32      # z dim
C = 3            # generated image channels
H = W = 16       # generated image spatial size
OUT_HW = 224     # interpolate target (fixed by the module)
NUM_CLASSES = 10 # stand-in "alexnet" head output size
HW = H * W


# --------------------- single fused Pallas kernel --------------------------
def _combined_kernel(z_ref, wg_ref, wf_ref, b_ref, o_ref):
    # z_ref : (B, LATENT)
    # wg_ref: (LATENT, C*H*W)        generator stand-in weight
    # wf_ref: (H*W, NUM_CLASSES)     folded (bilinear ∘ normalize ∘ linear-head) weight
    # b_ref : (1, NUM_CLASSES)       classifier bias (lane-dense)
    # o_ref : (B, NUM_CLASSES)       logits (lane-dense)

    # Generator stand-in: tanh(z @ Wg) -> image in [-1, 1], flat layout
    # flat[b, c*H*W + h*W + w].
    flat = jnp.tanh(
        jnp.dot(z_ref[...], wg_ref[...], preferred_element_type=jnp.float32)
    )  # (B, C*H*W)

    # Channel mean via static lane slices (c*HW = multiples of 256 -> tile aligned),
    # no sublane relayout needed.
    m = flat[:, 0:HW]
    for c in range(1, C):
        m = m + flat[:, c * HW:(c + 1) * HW]
    m = m * (1.0 / C)  # (B, H*W), flat index i*W + j

    # (img+1)/2, the bilinear 224x224 resize, Normalize((0.5,),(0.5,)) and the
    # flatten+linear head are all folded into wf offline (exact for the linear
    # stand-in): logits = m @ (Wy^T Wc Wx)_flat + b.
    logits = jnp.dot(m, wf_ref[...], preferred_element_type=jnp.float32)  # (B, NUM_CLASSES)
    o_ref[...] = logits + b_ref[...]


def combined_model_forward(z, w_gen, wf_flat, b_clf):
    return pl.pallas_call(
        _combined_kernel,
        out_shape=jax.ShapeDtypeStruct((B, NUM_CLASSES), jnp.float32),
        in_specs=[
            pl.BlockSpec((B, LATENT), lambda: (0, 0)),
            pl.BlockSpec((LATENT, C * H * W), lambda: (0, 0)),
            pl.BlockSpec((HW, NUM_CLASSES), lambda: (0, 0)),
            pl.BlockSpec((1, NUM_CLASSES), lambda: (0, 0)),
        ],
        out_specs=pl.BlockSpec((B, NUM_CLASSES), lambda: (0, 0)),
    )(z, w_gen, wf_flat, b_clf)


# ----------------- bilinear interpolation matrices (glue) -------------------
def bilinear_matrix(in_size, out_size):
    """Dense (out_size, in_size) matrix reproducing torch's bilinear
    interpolate with align_corners=False along one axis."""
    scale = in_size / out_size
    o = jnp.arange(out_size, dtype=jnp.float32)
    src = (o + 0.5) * scale - 0.5
    src = jnp.maximum(src, 0.0)                    # torch clamps negative src to 0
    i0 = jnp.floor(src)
    frac = src - i0
    i0c = jnp.clip(i0.astype(jnp.int32), 0, in_size - 1)
    i1c = jnp.clip(i0.astype(jnp.int32) + 1, 0, in_size - 1)
    rows = jnp.arange(out_size)
    m = jnp.zeros((out_size, in_size), dtype=jnp.float32)
    m = m.at[rows, i0c].add(1.0 - frac)
    m = m.at[rows, i1c].add(frac)
    return m


# -------------------- pure-JAX reference (unfused chain) --------------------
def reference_forward(z, w_gen, w_clf, b_clf, wy, wx):
    hi = jax.lax.Precision.HIGHEST
    flat = jnp.tanh(jnp.dot(z, w_gen, precision=hi))                 # (B, C*H*W)
    img = flat.reshape(B, C, H, W)
    img = (img + 1.0) / 2.0                                          # (img + 1) / 2
    m = jnp.mean(img, axis=1, keepdims=True)                         # mean over C
    up = jnp.einsum("ph,bchw,qw->bcpq", wy, m, wx, precision=hi)     # bilinear 224x224
    up = (up - 0.5) / 0.5                                            # Normalize((0.5,),(0.5,))
    up_flat = up.reshape(B, OUT_HW * OUT_HW)
    wc_flat = w_clf.reshape(NUM_CLASSES, OUT_HW * OUT_HW)
    return jnp.dot(up_flat, wc_flat.T, precision=hi) + b_clf         # flatten+linear head


if __name__ == "__main__":
    key = jax.random.PRNGKey(0)
    k_z, k_g, k_c, k_b = jax.random.split(key, 4)

    z = jax.random.normal(k_z, (B, LATENT), dtype=jnp.float32)
    w_gen = 0.1 * jax.random.normal(k_g, (LATENT, C * H * W), dtype=jnp.float32)
    # Stand-in classifier weight in its natural (NUM_CLASSES, 224, 224) form.
    w_clf = 0.01 * jax.random.normal(
        k_c, (NUM_CLASSES, OUT_HW, OUT_HW), dtype=jnp.float32)
    b_clf = 0.01 * jax.random.normal(k_b, (1, NUM_CLASSES), dtype=jnp.float32)

    wy = bilinear_matrix(H, OUT_HW)   # (224, 16) row interpolation
    wx = bilinear_matrix(W, OUT_HW)   # (224, 16) column interpolation

    # Offline fold: wf[n, i, j] = sum_{p,q} wy[p, i] * w_clf[n, p, q] * wx[q, j]
    # (valid only because the stand-in head is linear; runs once at setup).
    wf = jnp.einsum("pi,npq,qj->nij", wy, w_clf, wx,
                    precision=jax.lax.Precision.HIGHEST)             # (10, 16, 16)
    wf_flat = wf.reshape(NUM_CLASSES, HW).T                          # (256, 10), row = i*W + j

    out = combined_model_forward(z, w_gen, wf_flat, b_clf)
    out = jax.block_until_ready(out)

    ref = jax.block_until_ready(reference_forward(z, w_gen, w_clf, b_clf, wy, wx))

    assert out.shape == (B, NUM_CLASSES) and out.dtype == jnp.float32
    assert bool(jnp.all(jnp.isfinite(out)))
    assert bool(jnp.allclose(out, ref, rtol=2e-2, atol=2e-2))
    print("KERNEL_OK")
</pallas_src>

<mosaic_0001>
module attributes {stable_mosaic.version = 11 : i64} {
  func.func @_combined_kernel(%arg0: memref<2x32xf32, #tpu.memory_space<vmem>>, %arg1: memref<32x768xf32, #tpu.memory_space<vmem>>, %arg2: memref<256x10xf32, #tpu.memory_space<vmem>>, %arg3: memref<1x10xf32, #tpu.memory_space<vmem>>, %arg4: memref<2x10xf32, #tpu.memory_space<vmem>>) attributes {dimension_semantics = [], scalar_prefetch = 0 : i64, scratch_operands = 0 : i64, tpu.core_type = #tpu.core_type<tc>} {
    %c0 = arith.constant 0 : index
    %c0_0 = arith.constant 0 : index
    %0 = vector.load %arg0[%c0, %c0_0] : memref<2x32xf32, #tpu.memory_space<vmem>>, vector<2x32xf32>
    %c0_1 = arith.constant 0 : index
    %c0_2 = arith.constant 0 : index
    %1 = vector.load %arg1[%c0_1, %c0_2] : memref<32x768xf32, #tpu.memory_space<vmem>>, vector<32x768xf32>
    %cst = arith.constant dense<0.000000e+00> : vector<2x768xf32>
    %2 = tpu.matmul %0, %1, %cst {dimension_numbers = #tpu.dot_dimension_numbers<[1], [0], [0], [1], [0, 0, 1, 1], [], []>} : vector<2x32xf32>, vector<32x768xf32>, vector<2x768xf32> -> vector<2x768xf32>
    %3 = math.tanh %2 : vector<2x768xf32>
    %4 = vector.extract_strided_slice %3 {offsets = [0, 0], sizes = [2, 256], strides = [1, 1]} : vector<2x768xf32> to vector<2x256xf32>
    %5 = vector.extract_strided_slice %3 {offsets = [0, 256], sizes = [2, 256], strides = [1, 1]} : vector<2x768xf32> to vector<2x256xf32>
    %6 = arith.addf %4, %5 : vector<2x256xf32>
    %7 = vector.extract_strided_slice %3 {offsets = [0, 512], sizes = [2, 256], strides = [1, 1]} : vector<2x768xf32> to vector<2x256xf32>
    %8 = arith.addf %6, %7 : vector<2x256xf32>
    %cst_3 = arith.constant 0.333333343 : f32
    %9 = vector.broadcast %cst_3 : f32 to vector<2x256xf32>
    %10 = arith.mulf %8, %9 : vector<2x256xf32>
    %c0_4 = arith.constant 0 : index
    %c0_5 = arith.constant 0 : index
    %11 = vector.load %arg2[%c0_4, %c0_5] : memref<256x10xf32, #tpu.memory_space<vmem>>, vector<256x10xf32>
    %cst_6 = arith.constant dense<0.000000e+00> : vector<2x10xf32>
    %12 = tpu.matmul %10, %11, %cst_6 {dimension_numbers = #tpu.dot_dimension_numbers<[1], [0], [0], [1], [0, 0, 1, 1], [], []>} : vector<2x256xf32>, vector<256x10xf32>, vector<2x10xf32> -> vector<2x10xf32>
    %c0_7 = arith.constant 0 : index
    %c0_8 = arith.constant 0 : index
    %13 = vector.load %arg3[%c0_7, %c0_8] : memref<1x10xf32, #tpu.memory_space<vmem>>, vector<1x10xf32>
    %14 = vector.broadcast %13 : vector<1x10xf32> to vector<2x10xf32>
    %15 = arith.addf %12, %14 : vector<2x10xf32>
    %c0_9 = arith.constant 0 : index
    %c0_10 = arith.constant 0 : index
    %16 = vector.load %arg4[%c0_9, %c0_10] : memref<2x10xf32, #tpu.memory_space<vmem>>, vector<2x10xf32>
    tpu.vector_store %arg4[%c0_9, %c0_10], %15 {strides = array<i32>} : memref<2x10xf32, #tpu.memory_space<vmem>>, vector<2x10xf32>,
    return
  }
}

</mosaic_0001>

<bundles_post_ra>
// kernel: tpu_custom_call.1
= control target key start
LH: loop header
LB: loop body
LE: loop exit
PB: predicated region body
PF: predicated region fallthrough
CT: control target
= control target key end

     0   :  { %v472_v4 = vmov 0.0   ;;  %vm43_vm0 = vcmask 261120   ;;  %s679_s0 = inlined_call_operand.vmem [shape: f32[2,32], index: 0, kind: input, shape index: {}]   ;;  %s680_s1 = inlined_call_operand.vmem [shape: f32[32,768], index: 1, kind: input, shape index: {}]   ;;  %s681_s2 = inlined_call_operand.vmem [shape: f32[256,10], index: 2, kind: input, shape index: {}]   ;;  %s682_s3 = inlined_call_operand.vmem [shape: f32[1,10], index: 3, kind: input, shape index: {}]   ;;  %s683_s4 = inlined_call_operand.hbm [shape: f32[2,10], index: 4, kind: output, shape index: {}]  }
   0x1   :  { %v38_v0 = vld [vmem:[%s680_s1 + $0x98] sm:$0xff]  ;;  %v37_v1 = vld [vmem:[%s680_s1 + $0x90] sm:$0xff]  ;;  %v32_v2 = vld [vmem:[%s680_s1 + $0x68] sm:$0xff]  ;;  %111 = vmatprep.mubr.f32.mxu0 %v472_v4 }
   0x2   :  { %71 = vmatprep.subr.mxu0 %v38_v0  ;;  %v31_v3 = vld [vmem:[%s680_s1 + $0x60] sm:$0xff]  ;;  %v26_v5 = vld [vmem:[%s680_s1 + $0x38] sm:$0xff]  ;;  %v25_v6 = vld [vmem:[%s680_s1 + $0x30] sm:$0xff] }
   0x3   :  { %72 = vmatpush1.msra.mxu0 %v37_v1  ;;  %v20_v7 = vld [vmem:[%s680_s1 + $0x8] sm:$0xff]  ;;  %v19_v8 = vld [vmem:[%s680_s1] sm:$0xff]  ;;  %v34_v12 = vld [vmem:[%s680_s1 + $0x78] sm:$0xff] }
   0x4   :  { %73 = vmatprep.subr.mxu0 %v32_v2  ;;  %v18_v9 = vld [vmem:[%s679_s0] sm:$0x3]  ;;  %v40_v10 = vld [vmem:[%s680_s1 + $0xa8] sm:$0xff] }
   0x5   :  { %74 = vmatpush1.msra.mxu0 %v31_v3  ;;  %v39_v11 = vld [vmem:[%s680_s1 + $0xa0] sm:$0xff] }
   0x6   :  { %75 = vmatprep.subr.mxu0 %v26_v5 }
   0x7   :  { %76 = vmatpush1.msra.mxu0 %v25_v6 }
   0x8   :  { %77 = vmatprep.subr.mxu0 %v20_v7 }
   0x9   :  { %78 = vmatpush1.msra.mxu0 %v19_v8 }
   0xa   :  { %9 = vsyncpa [#allocation3], 0  ;;  %397 = vmatmul.mubr.msk.f32.vlgmr.msra.gmra.mxu0 %vm43_vm0, %v18_v9  ;;  %142 = vmatprep.subr.mxu0 %v40_v10  ;;  %v33_v13 = vld [vmem:[%s680_s1 + $0x70] sm:$0xff]  ;;  %v28_v14 = vld [vmem:[%s680_s1 + $0x48] sm:$0xff]  ;;  %s473_s19 = smov [#allocation2]   ;;  %vm381_vm1 = vcmask 74752  }
   0xb   :  { %143 = vmatpush1.msra.mxu0 %v39_v11  ;;  %182 = vmatprep.mubr.f32.mxu0 %v472_v4  ;;  %v27_v15 = vld [vmem:[%s680_s1 + $0x40] sm:$0xff]  ;;  %v22_v16 = vld [vmem:[%s680_s1 + $0x18] sm:$0xff]  ;;  %v21_v17 = vld [vmem:[%s680_s1 + $0x10] sm:$0xff]  ;;  %s389_s20 = sshll.u32 %s473_s19, 4  ;;  %s390_s20 = int_to_ptr.vmem [resolvable:$true] %s389_s20 }
   0xc   :  { %144 = vmatprep.subr.mxu0 %v34_v12  ;;  %v42_v18 = vld [vmem:[%s680_s1 + $0xb8] sm:$0xff]  ;;  %v41_v19 = vld [vmem:[%s680_s1 + $0xb0] sm:$0xff]  ;;  %v36_v20 = vld [vmem:[%s680_s1 + $0x88] sm:$0xff]  ;;  %s450_s21 = scalar_lea.vmem %s390_s20, 32  ;;  %p455_p1 = scmp.lt.s32.totalorder %s390_s20, %s390_s20 }
   0xd   :  { %145 = vmatpush1.msra.mxu0 %v33_v13  ;;  %v35_v21 = vld [vmem:[%s680_s1 + $0x80] sm:$0xff]  ;;  %v30_v22 = vld [vmem:[%s680_s1 + $0x58] sm:$0xff]  ;;  %v29_v23 = vld [vmem:[%s680_s1 + $0x50] sm:$0xff]  ;;  %p451_p0 = scmp.ne.s32.totalorder %s390_s20, %s450_s21  ;;  %p456_p2 = scmp.lt.s32.totalorder %s450_s21, %s450_s21 }
   0xe   :  { %146 = vmatprep.subr.mxu0 %v28_v14  ;;  %v24_v24 = vld [vmem:[%s680_s1 + $0x28] sm:$0xff]  ;;  %v23_v25 = vld [vmem:[%s680_s1 + $0x20] sm:$0xff]  ;;  %v303_v26 = vld [vmem:[%s681_s2 + $0xf8] sm:$0xff] }
   0xf   :  { %147 = vmatpush1.msra.mxu0 %v27_v15  ;;  %v287_v27 = vld [vmem:[%s681_s2 + $0x78] sm:$0xff]  ;;  %401 = vmatprep.subr.mxu1 %v303_v26  ;;  %v302_v28 = vld [vmem:[%s681_s2 + $0xf0] sm:$0xff]  ;;  %v301_v30 = vld [vmem:[%s681_s2 + $0xe8] sm:$0xff]  ;;  %p457_p3 = por %p456_p2, %p455_p1 }
  0x10   :  { %148 = vmatprep.subr.mxu0 %v22_v16  ;;  %402 = vmatpush3.msra.mxu1 %v287_v27  ;;  %v286_v29 = vld [vmem:[%s681_s2 + $0x70] sm:$0xff]  ;;  %v285_v31 = vld [vmem:[%s681_s2 + $0x68] sm:$0xff]  ;;  %v300_v32 = vld [vmem:[%s681_s2 + $0xe0] sm:$0xff] }
  0x11   :  { %149 = vmatpush1.msra.mxu0 %v21_v17  ;;  %403 = vmatprep.subr.mxu1 %v302_v28  ;;  %v284_v33 = vld [vmem:[%s681_s2 + $0x60] sm:$0xff]  ;;  %v299_v34 = vld [vmem:[%s681_s2 + $0xd8] sm:$0xff]  ;;  %v298_v36 = vld [vmem:[%s681_s2 + $0xd0] sm:$0xff]  ;;  %p458_p4 = pnand %p457_p3, %p451_p0 }
  0x12   :  { %398 = vmatmul.mubr.msk.f32.vlgmr.msra.gmra.mxu0 %vm43_vm0, %v18_v9  ;;  %213 = vmatprep.subr.mxu0 %v42_v18  ;;  %v283_v35 = vld [vmem:[%s681_s2 + $0x58] sm:$0xff]  ;;  %v282_v37 = vld [vmem:[%s681_s2 + $0x50] sm:$0xff]  ;;  %v297_v38 = vld [vmem:[%s681_s2 + $0xc8] sm:$0xff] }
  0x13   :  { %214 = vmatpush1.msra.mxu0 %v41_v19  ;;  %253 = vmatprep.mubr.f32.mxu0 %v472_v4  ;;  %v281_v39 = vld [vmem:[%s681_s2 + $0x48] sm:$0xff]  ;;  %v296_v40 = vld [vmem:[%s681_s2 + $0xc0] sm:$0xff]  ;;  %v295_v42 = vld [vmem:[%s681_s2 + $0xb8] sm:$0xff] }
  0x14   :  { %215 = vmatprep.subr.mxu0 %v36_v20  ;;  %404 = vmatpush3.msra.mxu1 %v286_v29  ;;  %v280_v41 = vld [vmem:[%s681_s2 + $0x40] sm:$0xff]  ;;  %v279_v43 = vld [vmem:[%s681_s2 + $0x38] sm:$0xff]  ;;  %v294_v44 = vld [vmem:[%s681_s2 + $0xb0] sm:$0xff] }
  0x15   :  { %216 = vmatpush1.msra.mxu0 %v35_v21  ;;  %405 = vmatprep.subr.mxu1 %v301_v30  ;;  %v278_v45 = vld [vmem:[%s681_s2 + $0x30] sm:$0xff]  ;;  %v293_v46 = vld [vmem:[%s681_s2 + $0xa8] sm:$0xff]  ;;  %v292_v48 = vld [vmem:[%s681_s2 + $0xa0] sm:$0xff] }
  0x16   :  { %217 = vmatprep.subr.mxu0 %v30_v22  ;;  %406 = vmatpush3.msra.mxu1 %v285_v31  ;;  %v277_v47 = vld [vmem:[%s681_s2 + $0x28] sm:$0xff]  ;;  %v276_v49 = vld [vmem:[%s681_s2 + $0x20] sm:$0xff]  ;;  %v291_v50 = vld [vmem:[%s681_s2 + $0x98] sm:$0xff] }
  0x17   :  { %218 = vmatpush1.msra.mxu0 %v29_v23  ;;  %407 = vmatprep.subr.mxu1 %v300_v32  ;;  %v275_v51 = vld [vmem:[%s681_s2 + $0x18] sm:$0xff]  ;;  %v290_v52 = vld [vmem:[%s681_s2 + $0x90] sm:$0xff]  ;;  %v289_v54 = vld [vmem:[%s681_s2 + $0x88] sm:$0xff] }
  0x18   :  { %219 = vmatprep.subr.mxu0 %v24_v24  ;;  %408 = vmatpush3.msra.mxu1 %v284_v33  ;;  %v274_v53 = vld [vmem:[%s681_s2 + $0x10] sm:$0xff]  ;;  %v273_v55 = vld [vmem:[%s681_s2 + $0x8] sm:$0xff]  ;;  %v288_v56 = vld [vmem:[%s681_s2 + $0x80] sm:$0xff] }
  0x19   :  { %220 = vmatpush1.msra.mxu0 %v23_v25  ;;  %409 = vmatprep.subr.mxu1 %v299_v34  ;;  %v272_v57 = vld [vmem:[%s681_s2] sm:$0xff] }
  0x1a   :  { %399 = vmatmul.mubr.msk.f32.vlgmr.msra.gmra.mxu0 %vm43_vm0, %v18_v9  ;;  %410 = vmatpush3.msra.mxu1 %v283_v35  ;;  %v400_v13 = vld [vmem:[%s682_s3] ss:$0 sm:$0xff] }
  0x1b   :  { %411 = vmatprep.subr.mxu1 %v298_v36 }
  0x1c   :  { %412 = vmatpush3.msra.mxu1 %v282_v37 }
  0x1d   :  { %413 = vmatprep.subr.mxu1 %v297_v38 }
  0x1e   :  { %414 = vmatpush3.msra.mxu1 %v281_v39 }
  0x1f   :  { %415 = vmatprep.subr.mxu1 %v296_v40 }
  0x20   :  { %416 = vmatpush3.msra.mxu1 %v280_v41 }
  0x21   :  { %417 = vmatprep.subr.mxu1 %v295_v42 }
  0x22   :  { %418 = vmatpush3.msra.mxu1 %v279_v43 }
  0x23   :  { %419 = vmatprep.subr.mxu1 %v294_v44 }
  0x24   :  { %420 = vmatpush3.msra.mxu1 %v278_v45 }
  0x25   :  { %421 = vmatprep.subr.mxu1 %v293_v46 }
  0x26   :  { %422 = vmatpush3.msra.mxu1 %v277_v47 }
  0x27   :  { %423 = vmatprep.subr.mxu1 %v292_v48 }
  0x28   :  { %424 = vmatpush3.msra.mxu1 %v276_v49 }
  0x29   :  { %425 = vmatprep.subr.mxu1 %v291_v50 }
  0x2a   :  { %426 = vmatpush3.msra.mxu1 %v275_v51 }
  0x2b   :  { %427 = vmatprep.subr.mxu1 %v290_v52 }
  0x2c   :  { %428 = vmatpush3.msra.mxu1 %v274_v53 }
  0x2d   :  { %429 = vmatprep.subr.mxu1 %v289_v54 }
  0x2e   :  { %430 = vmatpush3.msra.mxu1 %v273_v55 }
  0x2f   :  { %431 = vmatprep.subr.mxu1 %v288_v56 }
  0x30   :  { %432 = vmatpush3.msra.mxu1 %v272_v57 }
  0xca   :  { %v113_v58 = vpop.f32.mrf.mxu0 }
  0xcb   :  { %438 = vtanh.f32 %v113_v58 }
  0xcc   :  { %v115_v59 = vpop.f32.mrf.mxu0 }
  0xd2   :  { %v184_v60 = vpop.f32.mrf.mxu0 }
  0xd3   :  { %440 = vtanh.f32 %v184_v60 }
  0xd4   :  { %v186_v61 = vpop.f32.mrf.mxu0 }
  0xd5   :  { %442 = vtanh.f32 %v186_v61 }
  0xd6   :  { %444 = vtanh.f32 %v115_v59 }
  0xd8   :  { %v439_v0 = vpop.eup %438 }
  0xda   :  { %v255_v62 = vpop.f32.mrf.mxu0 }
  0xdb   :  { %446 = vtanh.f32 %v255_v62 }
  0xdc   :  { %v257_v63 = vpop.f32.mrf.mxu0 }
  0xdd   :  { %448 = vtanh.f32 %v257_v63 }
  0xe0   :  { %v441_v1 = vpop.eup %440 }
  0xe1   :  { %v266_v5 = vadd.f32 %v441_v1, %v439_v0 }
  0xe2   :  { %v443_v2 = vpop.eup %442 }
  0xe3   :  { %v445_v3 = vpop.eup %444 }
  0xe4   :  { %v267_v6 = vadd.f32 %v445_v3, %v443_v2 }
  0xe8   :  { %v447_v4 = vpop.eup %446 }
  0xe9   :  { %v268_v8 = vadd.f32 %v447_v4, %v266_v5 }
  0xea   :  { %v449_v7 = vpop.eup %448 }
  0xeb   :  { %v269_v9 = vadd.f32 %v449_v7, %v267_v6  ;;  %v270_v11 = vmul.f32 0.33333334, %v268_v8 }
  0xed   :  { %v271_v10 = vmul.f32 0.33333334, %v269_v9 }
  0xef   :  { %375 = vmatprep.mubr.f32.mxu1 %v271_v10 }
  0xf0   :  { %376 = vmatmul.mubr.f32.vlgmr.msra.gmra.mxu1 %v270_v11 }
 0x1b0   :  { %v433_v12 = vpop.f32.mrf.mxu1 }
 0x1b2   :  { %v434_v14 = vpop.f32.mrf.mxu1 }
 0x1b3   :  { %v435_v15 = vadd.f32 %v434_v14, %v433_v12 }
 0x1b5   :  { %v378_v16 = vadd.f32 %v435_v15, %v400_v13 }
 0x1b7   :  { %382 = vst.msk [vmem:[#allocation2] sm:$0x3] %vm381_vm1, %v378_v16 }
 0x1b8   :  { %461 = shalt.err (!%p458_p4)
}
 0x1b9   :  { %392 = dma.vmem_to_hbm [thread:$0]  %s390_s20, 32, %s683_s4, [#allocation3]  }
 0x1ba   :  { %470 = dma.done.wait [#allocation3], 32  }
 0x1bb   :  { %471 = vsyncadd [#allocation3], 4294967264 }
 0x1bc   :  { %396 = vsyncpa [#allocation3], 1 }

</bundles_post_ra>
